<compile_context>
chip_gen: v5e
topology: v5e:2x2
jax: 0.10.0
libtpu: 0.0.40
codegen_flags: <defaults>
</compile_context>

<pallas_src>
import functools

import jax
import jax.numpy as jnp
from jax import lax
from jax.experimental import pallas as pl
from jax.experimental.pallas import tpu as pltpu

_LANE = 128
_MAX_TILE_D = 16384            # lanes per D tile -> <=128 fully-unrolled chunks per step
_MAX_TILE_B = 256              # rows per batch tile cap
_BLOCK_TARGET_BYTES = 1 << 20  # ~1 MiB per input block per grid step


def _round_up(x, m):
    return (x + m - 1) // m * m


def _sublane_for(dtype):
    return {4: 8, 2: 16, 1: 32}.get(jnp.dtype(dtype).itemsize, 8)


def _cosine_loss_kernel(x1_ref, x2_ref, out_ref, dot_acc, s1_acc, s2_acc,
                        *, true_d, tile_d, need_mask):
    # x1_ref/x2_ref: (tile_b, tile_d) native-dtype tiles in VMEM
    # out_ref:       (tile_b, 1) f32 per-row cosine distance
    # *_acc:         (tile_b, 128) f32 lane-wise accumulators (persist across the D grid axis)
    k = pl.program_id(1)

    @pl.when(k == 0)
    def _init():
        dot_acc[...] = jnp.zeros_like(dot_acc)
        s1_acc[...] = jnp.zeros_like(s1_acc)
        s2_acc[...] = jnp.zeros_like(s2_acc)

    tile_b = x1_ref.shape[0]
    nchunks = tile_d // _LANE
    d_base = k * tile_d  # global column offset of this D tile

    if need_mask:
        # Hoisted out of the chunk loop (JAX does not CSE broadcast_in_dim).
        lane_iota = lax.broadcasted_iota(jnp.int32, (tile_b, _LANE), 1)

    # Lane-wise accumulation: plain VPU adds per 128-wide chunk, no per-tile XLU reduce.
    p = jnp.zeros((tile_b, _LANE), jnp.float32)
    q1 = jnp.zeros((tile_b, _LANE), jnp.float32)
    q2 = jnp.zeros((tile_b, _LANE), jnp.float32)
    for c in range(nchunks):  # static unroll (nchunks <= 128 by construction)
        lo = c * _LANE
        a1 = x1_ref[:, lo:lo + _LANE].astype(jnp.float32)  # in-kernel upcast (native stream)
        a2 = x2_ref[:, lo:lo + _LANE].astype(jnp.float32)
        if need_mask:
            # Zero out lanes beyond the true feature dim (last D tile may be ragged; the
            # out-of-bounds part of the VMEM block holds undefined data).
            valid = (lane_iota + (d_base + lo)) < true_d
            a1 = jnp.where(valid, a1, 0.0)
            a2 = jnp.where(valid, a2, 0.0)
        p = p + a1 * a2
        q1 = q1 + a1 * a1
        q2 = q2 + a2 * a2

    dot_acc[...] += p
    s1_acc[...] += q1
    s2_acc[...] += q2

    @pl.when(k == pl.num_programs(1) - 1)
    def _finalize():
        dot = jnp.sum(dot_acc[...], axis=-1, keepdims=True)  # (tile_b, 1)
        s1 = jnp.sum(s1_acc[...], axis=-1, keepdims=True)
        s2 = jnp.sum(s2_acc[...], axis=-1, keepdims=True)
        eps = jnp.float32(1e-8)
        # F.cosine_similarity clamps each norm separately:
        #   cos = dot / (max(||x1||, eps) * max(||x2||, eps))
        # rsqrt (EUP) + clamp of the reciprocal is equivalent: min(1/||x||, 1/eps).
        inv1 = jnp.minimum(lax.rsqrt(s1), 1.0 / eps)
        inv2 = jnp.minimum(lax.rsqrt(s2), 1.0 / eps)
        out_ref[...] = 1.0 - dot * inv1 * inv2


def cosine_distance_loss(input1, input2):
    """Pallas implementation of CosineDistanceLoss.forward. Returns a scalar f32 loss."""
    b = input1.shape[0]
    x1 = input1.reshape(b, -1)  # no dtype cast, no padding: stream native data from HBM
    x2 = input2.reshape(b, -1)
    d = x1.shape[1]

    sublane = max(_sublane_for(x1.dtype), _sublane_for(x2.dtype))
    itemsize = max(jnp.dtype(x1.dtype).itemsize, jnp.dtype(x2.dtype).itemsize)

    d128 = _round_up(d, _LANE)
    target_elems = max(_BLOCK_TARGET_BYTES // itemsize, sublane * _LANE)

    # Feature tile first (long contiguous rows -> efficient DMA), then grow the batch tile
    # until each per-step input block is ~1 MiB.  tile_b * tile_d * itemsize <= 1 MiB always.
    tb0 = b if b < sublane else sublane
    tile_d = min(d128, _MAX_TILE_D,
                 max(_LANE, (target_elems // tb0) // _LANE * _LANE))
    if b <= sublane:
        tile_b = b  # full-extent batch block (allowed even if not a sublane multiple)
    else:
        tile_b = max(sublane,
                     min(_MAX_TILE_B, target_elems // tile_d) // sublane * sublane)
        tile_b = min(tile_b, _round_up(b, sublane))

    grid = (pl.cdiv(b, tile_b), pl.cdiv(d, tile_d))
    need_mask = (d % tile_d) != 0  # only then can a D tile run past the true feature dim

    kernel = functools.partial(_cosine_loss_kernel,
                               true_d=d, tile_d=tile_d, need_mask=need_mask)

    per_row = pl.pallas_call(
        kernel,
        out_shape=jax.ShapeDtypeStruct((b, 1), jnp.float32),
        grid_spec=pltpu.PrefetchScalarGridSpec(
            num_scalar_prefetch=0,
            grid=grid,
            in_specs=[
                pl.BlockSpec((tile_b, tile_d), lambda i, k: (i, k)),
                pl.BlockSpec((tile_b, tile_d), lambda i, k: (i, k)),
            ],
            out_specs=pl.BlockSpec((tile_b, 1), lambda i, k: (i, 0)),
            scratch_shapes=[pltpu.VMEM((tile_b, _LANE), jnp.float32)] * 3,
        ),
        compiler_params=pltpu.CompilerParams(
            dimension_semantics=("parallel", "arbitrary"),
        ),
    )(x1, x2)

    # Final mean over the real batch rows (out-of-bounds rows were dropped on store).
    return jnp.mean(per_row)


def _reference(x1, x2):
    # Pure-JAX reference matching torch.nn.functional.cosine_similarity semantics.
    b = x1.shape[0]
    f1 = x1.reshape(b, -1).astype(jnp.float32)
    f2 = x2.reshape(b, -1).astype(jnp.float32)
    eps = jnp.float32(1e-8)
    n1 = jnp.maximum(jnp.linalg.norm(f1, axis=-1), eps)
    n2 = jnp.maximum(jnp.linalg.norm(f2, axis=-1), eps)
    cos = jnp.sum(f1 * f2, axis=-1) / (n1 * n2)
    return jnp.mean(1.0 - cos)


if __name__ == "__main__":
    key = jax.random.PRNGKey(0)
    ks = jax.random.split(key, 8)

    # Case 1: module's implied shape — B=2, C=4, H=W=16, f32 (single grid step, no masking).
    a1 = jax.random.normal(ks[0], (2, 4, 16, 16), dtype=jnp.float32)
    a2 = jax.random.normal(ks[1], (2, 4, 16, 16), dtype=jnp.float32)
    l1 = cosine_distance_loss(a1, a2)
    jax.block_until_ready(l1)
    assert jnp.allclose(l1, _reference(a1, a2), atol=1e-5, rtol=1e-5), (l1, _reference(a1, a2))

    # Case 2: bf16 streamed natively, odd B, D not a multiple of 128 (ragged-lane mask, no pad).
    b1 = jax.random.normal(ks[2], (3, 4, 15, 15), dtype=jnp.bfloat16)
    b2 = jax.random.normal(ks[3], (3, 4, 15, 15), dtype=jnp.bfloat16)
    l2 = cosine_distance_loss(b1, b2)
    jax.block_until_ready(l2)
    assert jnp.allclose(l2, _reference(b1, b2), atol=1e-4, rtol=1e-4), (l2, _reference(b1, b2))

    # Case 3: B not a multiple of the sublane tile + ragged D (row OOB drop + lane masking).
    c1 = jax.random.normal(ks[4], (10, 3, 20, 20), dtype=jnp.float32)
    c2 = jax.random.normal(ks[5], (10, 3, 20, 20), dtype=jnp.float32)
    l3 = cosine_distance_loss(c1, c2)
    jax.block_until_ready(l3)
    assert jnp.allclose(l3, _reference(c1, c2), atol=1e-5, rtol=1e-5), (l3, _reference(c1, c2))

    # Case 4: D large enough for multiple D grid steps with a ragged final tile
    # (exercises cross-step accumulators + masking together).
    d1 = jax.random.normal(ks[6], (2, 4, 80, 80), dtype=jnp.float32)
    d2 = jax.random.normal(ks[7], (2, 4, 80, 80), dtype=jnp.float32)
    l4 = cosine_distance_loss(d1, d2)
    jax.block_until_ready(l4)
    assert jnp.allclose(l4, _reference(d1, d2), atol=1e-5, rtol=1e-5), (l4, _reference(d1, d2))

    print("KERNEL_OK")
</pallas_src>

<mosaic_0001>
module attributes {stable_mosaic.version = 11 : i64} {
  func.func @_cosine_loss_kernel(%arg0: i32, %arg1: i32, %arg2: memref<2x1024xf32, #tpu.memory_space<vmem>>, %arg3: memref<2x1024xf32, #tpu.memory_space<vmem>>, %arg4: memref<2x1xf32, #tpu.memory_space<vmem>>, %arg5: memref<2x128xf32, #tpu.memory_space<vmem>>, %arg6: memref<2x128xf32, #tpu.memory_space<vmem>>, %arg7: memref<2x128xf32, #tpu.memory_space<vmem>>) attributes {dimension_semantics = [#tpu.dimension_semantics<parallel>, #tpu.dimension_semantics<arbitrary>], iteration_bounds = array<i64: 1, 1>, scalar_prefetch = 0 : i64, scratch_operands = 3 : i64, tpu.core_type = #tpu.core_type<tc>, window_params = [{transform_indices = @transform_0, window_bounds = array<i64: 2, 1024>}, {transform_indices = @transform_1, window_bounds = array<i64: 2, 1024>}, {transform_indices = @transform_2, window_bounds = array<i64: 2, 1>}]} {
    %c0_i32 = arith.constant 0 : i32
    %0 = arith.cmpi eq, %arg1, %c0_i32 : i32
    %1 = arith.extui %0 : i1 to i32
    %c0_i32_0 = arith.constant 0 : i32
    %2 = arith.cmpi ne, %1, %c0_i32_0 : i32
    scf.if %2 {
      %cst_41 = arith.constant 0.000000e+00 : f32
      %82 = vector.broadcast %cst_41 : f32 to vector<2x128xf32>
      %c0_42 = arith.constant 0 : index
      %c0_43 = arith.constant 0 : index
      %83 = vector.load %arg5[%c0_42, %c0_43] : memref<2x128xf32, #tpu.memory_space<vmem>>, vector<2x128xf32>
      tpu.vector_store %arg5[%c0_42, %c0_43], %82 {strides = array<i32>} : memref<2x128xf32, #tpu.memory_space<vmem>>, vector<2x128xf32>,
      %cst_44 = arith.constant 0.000000e+00 : f32
      %84 = vector.broadcast %cst_44 : f32 to vector<2x128xf32>
      %c0_45 = arith.constant 0 : index
      %c0_46 = arith.constant 0 : index
      %85 = vector.load %arg6[%c0_45, %c0_46] : memref<2x128xf32, #tpu.memory_space<vmem>>, vector<2x128xf32>
      tpu.vector_store %arg6[%c0_45, %c0_46], %84 {strides = array<i32>} : memref<2x128xf32, #tpu.memory_space<vmem>>, vector<2x128xf32>,
      %cst_47 = arith.constant 0.000000e+00 : f32
      %86 = vector.broadcast %cst_47 : f32 to vector<2x128xf32>
      %c0_48 = arith.constant 0 : index
      %c0_49 = arith.constant 0 : index
      %87 = vector.load %arg7[%c0_48, %c0_49] : memref<2x128xf32, #tpu.memory_space<vmem>>, vector<2x128xf32>
      tpu.vector_store %arg7[%c0_48, %c0_49], %86 {strides = array<i32>} : memref<2x128xf32, #tpu.memory_space<vmem>>, vector<2x128xf32>,
    } else {
    }
    %cst = arith.constant 0.000000e+00 : f32
    %3 = vector.broadcast %cst : f32 to vector<2x128xf32>
    %cst_1 = arith.constant 0.000000e+00 : f32
    %4 = vector.broadcast %cst_1 : f32 to vector<2x128xf32>
    %cst_2 = arith.constant 0.000000e+00 : f32
    %5 = vector.broadcast %cst_2 : f32 to vector<2x128xf32>
    %c0 = arith.constant 0 : index
    %c0_3 = arith.constant 0 : index
    %6 = vector.load %arg2[%c0, %c0_3] : memref<2x1024xf32, #tpu.memory_space<vmem>>, vector<2x128xf32>
    %c0_4 = arith.constant 0 : index
    %c0_5 = arith.constant 0 : index
    %7 = vector.load %arg3[%c0_4, %c0_5] : memref<2x1024xf32, #tpu.memory_space<vmem>>, vector<2x128xf32>
    %8 = arith.mulf %6, %7 : vector<2x128xf32>
    %9 = arith.addf %3, %8 : vector<2x128xf32>
    %10 = arith.mulf %6, %6 : vector<2x128xf32>
    %11 = arith.addf %4, %10 : vector<2x128xf32>
    %12 = arith.mulf %7, %7 : vector<2x128xf32>
    %13 = arith.addf %5, %12 : vector<2x128xf32>
    %c0_6 = arith.constant 0 : index
    %c128 = arith.constant 128 : index
    %14 = vector.load %arg2[%c0_6, %c128] : memref<2x1024xf32, #tpu.memory_space<vmem>>, vector<2x128xf32>
    %c0_7 = arith.constant 0 : index
    %c128_8 = arith.constant 128 : index
    %15 = vector.load %arg3[%c0_7, %c128_8] : memref<2x1024xf32, #tpu.memory_space<vmem>>, vector<2x128xf32>
    %16 = arith.mulf %14, %15 : vector<2x128xf32>
    %17 = arith.addf %9, %16 : vector<2x128xf32>
    %18 = arith.mulf %14, %14 : vector<2x128xf32>
    %19 = arith.addf %11, %18 : vector<2x128xf32>
    %20 = arith.mulf %15, %15 : vector<2x128xf32>
    %21 = arith.addf %13, %20 : vector<2x128xf32>
    %c0_9 = arith.constant 0 : index
    %c256 = arith.constant 256 : index
    %22 = vector.load %arg2[%c0_9, %c256] : memref<2x1024xf32, #tpu.memory_space<vmem>>, vector<2x128xf32>
    %c0_10 = arith.constant 0 : index
    %c256_11 = arith.constant 256 : index
    %23 = vector.load %arg3[%c0_10, %c256_11] : memref<2x1024xf32, #tpu.memory_space<vmem>>, vector<2x128xf32>
    %24 = arith.mulf %22, %23 : vector<2x128xf32>
    %25 = arith.addf %17, %24 : vector<2x128xf32>
    %26 = arith.mulf %22, %22 : vector<2x128xf32>
    %27 = arith.addf %19, %26 : vector<2x128xf32>
    %28 = arith.mulf %23, %23 : vector<2x128xf32>
    %29 = arith.addf %21, %28 : vector<2x128xf32>
    %c0_12 = arith.constant 0 : index
    %c384 = arith.constant 384 : index
    %30 = vector.load %arg2[%c0_12, %c384] : memref<2x1024xf32, #tpu.memory_space<vmem>>, vector<2x128xf32>
    %c0_13 = arith.constant 0 : index
    %c384_14 = arith.constant 384 : index
    %31 = vector.load %arg3[%c0_13, %c384_14] : memref<2x1024xf32, #tpu.memory_space<vmem>>, vector<2x128xf32>
    %32 = arith.mulf %30, %31 : vector<2x128xf32>
    %33 = arith.addf %25, %32 : vector<2x128xf32>
    %34 = arith.mulf %30, %30 : vector<2x128xf32>
    %35 = arith.addf %27, %34 : vector<2x128xf32>
    %36 = arith.mulf %31, %31 : vector<2x128xf32>
    %37 = arith.addf %29, %36 : vector<2x128xf32>
    %c0_15 = arith.constant 0 : index
    %c512 = arith.constant 512 : index
    %38 = vector.load %arg2[%c0_15, %c512] : memref<2x1024xf32, #tpu.memory_space<vmem>>, vector<2x128xf32>
    %c0_16 = arith.constant 0 : index
    %c512_17 = arith.constant 512 : index
    %39 = vector.load %arg3[%c0_16, %c512_17] : memref<2x1024xf32, #tpu.memory_space<vmem>>, vector<2x128xf32>
    %40 = arith.mulf %38, %39 : vector<2x128xf32>
    %41 = arith.addf %33, %40 : vector<2x128xf32>
    %42 = arith.mulf %38, %38 : vector<2x128xf32>
    %43 = arith.addf %35, %42 : vector<2x128xf32>
    %44 = arith.mulf %39, %39 : vector<2x128xf32>
    %45 = arith.addf %37, %44 : vector<2x128xf32>
    %c0_18 = arith.constant 0 : index
    %c640 = arith.constant 640 : index
    %46 = vector.load %arg2[%c0_18, %c640] : memref<2x1024xf32, #tpu.memory_space<vmem>>, vector<2x128xf32>
    %c0_19 = arith.constant 0 : index
    %c640_20 = arith.constant 640 : index
    %47 = vector.load %arg3[%c0_19, %c640_20] : memref<2x1024xf32, #tpu.memory_space<vmem>>, vector<2x128xf32>
    %48 = arith.mulf %46, %47 : vector<2x128xf32>
    %49 = arith.addf %41, %48 : vector<2x128xf32>
    %50 = arith.mulf %46, %46 : vector<2x128xf32>
    %51 = arith.addf %43, %50 : vector<2x128xf32>
    %52 = arith.mulf %47, %47 : vector<2x128xf32>
    %53 = arith.addf %45, %52 : vector<2x128xf32>
    %c0_21 = arith.constant 0 : index
    %c768 = arith.constant 768 : index
    %54 = vector.load %arg2[%c0_21, %c768] : memref<2x1024xf32, #tpu.memory_space<vmem>>, vector<2x128xf32>
    %c0_22 = arith.constant 0 : index
    %c768_23 = arith.constant 768 : index
    %55 = vector.load %arg3[%c0_22, %c768_23] : memref<2x1024xf32, #tpu.memory_space<vmem>>, vector<2x128xf32>
    %56 = arith.mulf %54, %55 : vector<2x128xf32>
    %57 = arith.addf %49, %56 : vector<2x128xf32>
    %58 = arith.mulf %54, %54 : vector<2x128xf32>
    %59 = arith.addf %51, %58 : vector<2x128xf32>
    %60 = arith.mulf %55, %55 : vector<2x128xf32>
    %61 = arith.addf %53, %60 : vector<2x128xf32>
    %c0_24 = arith.constant 0 : index
    %c896 = arith.constant 896 : index
    %62 = vector.load %arg2[%c0_24, %c896] : memref<2x1024xf32, #tpu.memory_space<vmem>>, vector<2x128xf32>
    %c0_25 = arith.constant 0 : index
    %c896_26 = arith.constant 896 : index
    %63 = vector.load %arg3[%c0_25, %c896_26] : memref<2x1024xf32, #tpu.memory_space<vmem>>, vector<2x128xf32>
    %64 = arith.mulf %62, %63 : vector<2x128xf32>
    %65 = arith.addf %57, %64 : vector<2x128xf32>
    %66 = arith.mulf %62, %62 : vector<2x128xf32>
    %67 = arith.addf %59, %66 : vector<2x128xf32>
    %68 = arith.mulf %63, %63 : vector<2x128xf32>
    %69 = arith.addf %61, %68 : vector<2x128xf32>
    %c0_27 = arith.constant 0 : index
    %c0_28 = arith.constant 0 : index
    %70 = vector.load %arg5[%c0_27, %c0_28] : memref<2x128xf32, #tpu.memory_space<vmem>>, vector<2x128xf32>
    %71 = arith.addf %70, %65 : vector<2x128xf32>
    %c0_29 = arith.constant 0 : index
    %c0_30 = arith.constant 0 : index
    %72 = vector.load %arg5[%c0_29, %c0_30] : memref<2x128xf32, #tpu.memory_space<vmem>>, vector<2x128xf32>
    tpu.vector_store %arg5[%c0_29, %c0_30], %71 {strides = array<i32>} : memref<2x128xf32, #tpu.memory_space<vmem>>, vector<2x128xf32>,
    %c0_31 = arith.constant 0 : index
    %c0_32 = arith.constant 0 : index
    %73 = vector.load %arg6[%c0_31, %c0_32] : memref<2x128xf32, #tpu.memory_space<vmem>>, vector<2x128xf32>
    %74 = arith.addf %73, %67 : vector<2x128xf32>
    %c0_33 = arith.constant 0 : index
    %c0_34 = arith.constant 0 : index
    %75 = vector.load %arg6[%c0_33, %c0_34] : memref<2x128xf32, #tpu.memory_space<vmem>>, vector<2x128xf32>
    tpu.vector_store %arg6[%c0_33, %c0_34], %74 {strides = array<i32>} : memref<2x128xf32, #tpu.memory_space<vmem>>, vector<2x128xf32>,
    %c0_35 = arith.constant 0 : index
    %c0_36 = arith.constant 0 : index
    %76 = vector.load %arg7[%c0_35, %c0_36] : memref<2x128xf32, #tpu.memory_space<vmem>>, vector<2x128xf32>
    %77 = arith.addf %76, %69 : vector<2x128xf32>
    %c0_37 = arith.constant 0 : index
    %c0_38 = arith.constant 0 : index
    %78 = vector.load %arg7[%c0_37, %c0_38] : memref<2x128xf32, #tpu.memory_space<vmem>>, vector<2x128xf32>
    tpu.vector_store %arg7[%c0_37, %c0_38], %77 {strides = array<i32>} : memref<2x128xf32, #tpu.memory_space<vmem>>, vector<2x128xf32>,
    %c0_i32_39 = arith.constant 0 : i32
    %79 = arith.cmpi eq, %arg1, %c0_i32_39 : i32
    %80 = arith.extui %79 : i1 to i32
    %c0_i32_40 = arith.constant 0 : i32
    %81 = arith.cmpi ne, %80, %c0_i32_40 : i32
    scf.if %81 {
      %c0_41 = arith.constant 0 : index
      %c0_42 = arith.constant 0 : index
      %82 = vector.load %arg5[%c0_41, %c0_42] : memref<2x128xf32, #tpu.memory_space<vmem>>, vector<2x128xf32>
      %cst_43 = arith.constant dense<0.000000e+00> : vector<2xf32>
      %83 = vector.multi_reduction <add>, %82, %cst_43 [1] : vector<2x128xf32> to vector<2xf32>
      %84 = vector.shape_cast %83 : vector<2xf32> to vector<2x1xf32>
      %c0_44 = arith.constant 0 : index
      %c0_45 = arith.constant 0 : index
      %85 = vector.load %arg6[%c0_44, %c0_45] : memref<2x128xf32, #tpu.memory_space<vmem>>, vector<2x128xf32>
      %cst_46 = arith.constant dense<0.000000e+00> : vector<2xf32>
      %86 = vector.multi_reduction <add>, %85, %cst_46 [1] : vector<2x128xf32> to vector<2xf32>
      %87 = vector.shape_cast %86 : vector<2xf32> to vector<2x1xf32>
      %c0_47 = arith.constant 0 : index
      %c0_48 = arith.constant 0 : index
      %88 = vector.load %arg7[%c0_47, %c0_48] : memref<2x128xf32, #tpu.memory_space<vmem>>, vector<2x128xf32>
      %cst_49 = arith.constant dense<0.000000e+00> : vector<2xf32>
      %89 = vector.multi_reduction <add>, %88, %cst_49 [1] : vector<2x128xf32> to vector<2xf32>
      %90 = vector.shape_cast %89 : vector<2xf32> to vector<2x1xf32>
      %91 = math.rsqrt %87 : vector<2x1xf32>
      %cst_50 = arith.constant 1.000000e+00 : f32
      %cst_51 = arith.constant 9.99999993E-9 : f32
      %92 = arith.divf %cst_50, %cst_51 : f32
      %93 = vector.broadcast %92 : f32 to vector<2x1xf32>
      %94 = arith.minimumf %91, %93 : vector<2x1xf32>
      %95 = math.rsqrt %90 : vector<2x1xf32>
      %cst_52 = arith.constant 1.000000e+00 : f32
      %cst_53 = arith.constant 9.99999993E-9 : f32
      %96 = arith.divf %cst_52, %cst_53 : f32
      %97 = vector.broadcast %96 : f32 to vector<2x1xf32>
      %98 = arith.minimumf %95, %97 : vector<2x1xf32>
      %99 = arith.mulf %84, %94 : vector<2x1xf32>
      %100 = arith.mulf %99, %98 : vector<2x1xf32>
      %cst_54 = arith.constant 1.000000e+00 : f32
      %101 = vector.broadcast %cst_54 : f32 to vector<2x1xf32>
      %102 = arith.subf %101, %100 : vector<2x1xf32>
      %c0_55 = arith.constant 0 : index
      %c0_56 = arith.constant 0 : index
      %103 = vector.load %arg4[%c0_55, %c0_56] : memref<2x1xf32, #tpu.memory_space<vmem>>, vector<2x1xf32>
      tpu.vector_store %arg4[%c0_55, %c0_56], %102 {strides = array<i32>} : memref<2x1xf32, #tpu.memory_space<vmem>>, vector<2x1xf32>,
    } else {
    }
    return
  }
  func.func @transform_0(%arg0: i32, %arg1: i32) -> (i32, i32) {
    %c0_i32 = arith.constant 0 : i32
    return %arg0, %arg1 : i32, i32
  }
  func.func @transform_1(%arg0: i32, %arg1: i32) -> (i32, i32) {
    %c0_i32 = arith.constant 0 : i32
    return %arg0, %arg1 : i32, i32
  }
  func.func @transform_2(%arg0: i32, %arg1: i32) -> (i32, i32) {
    %c0_i32 = arith.constant 0 : i32
    %c0_i32_0 = arith.constant 0 : i32
    return %arg0, %c0_i32 : i32, i32
  }
}

</mosaic_0001>

<bundles_post_ra>
// kernel: tpu_custom_call.1
= control target key start
LH: loop header
LB: loop body
LE: loop exit
PB: predicated region body
PF: predicated region fallthrough
CT: control target
= control target key end

     0   :  { %7 = vsyncpa [#allocation6], 0  ;;  %s254_s0 = inlined_call_operand.hbm [shape: f32[2,1024], index: 0, kind: input, shape index: {}]   ;;  %s255_s1 = inlined_call_operand.hbm [shape: f32[2,1024], index: 1, kind: input, shape index: {}]   ;;  %s256_s2 = inlined_call_operand.vmem [shape: f32[2,1], index: 2, kind: output, shape index: {}]  }
   0x1   :  { %s14_s11 = sshll.u32 %s254_s0, 4  ;;  %s15_s11 = int_to_ptr.hbm [resolvable:$true] %s14_s11 }
   0x2   :  { %8 = vsyncpa [#allocation8], 0  ;;  %s227_s12 = smov [#allocation5]   ;;  %s25_s16 = sshll.u32 %s255_s1, 4  ;;  %s26_s16 = int_to_ptr.hbm [resolvable:$true] %s25_s16 }
   0x3   :  { %s16_s13 = sshll.u32 %s227_s12, 4  ;;  %s228_s17 = smov [#allocation7]   ;;  %s17_s13 = int_to_ptr.vmem [resolvable:$true] %s16_s13 }
   0x4   :  { %19 = dma.hbm_to_vmem [thread:$0]  %s15_s11, 256, %s17_s13, [#allocation6]  }
   0x5   :  { %s27_s18 = sshll.u32 %s228_s17, 4  ;;  %s28_s18 = int_to_ptr.vmem [resolvable:$true] %s27_s18 }
   0x6   :  { %30 = dma.hbm_to_vmem [thread:$0]  %s26_s16, 256, %s28_s18, [#allocation8]  }
   0x7   :  { %223 = dma.done.wait [#allocation6], 256  }
   0x8   :  { %224 = vsyncadd [#allocation6], 4294967040 }
   0x9   :  { %225 = dma.done.wait [#allocation8], 256  }
   0xa   :  { %226 = vsyncadd [#allocation8], 4294967040  ;;  %v229_v0 = vmov 0.0   ;;  %v46_v1 = vld [vmem:[#allocation5] sm:$0x3]  ;;  %vm123_vm0 = vcmask 1041408  }
   0xb   :  { %44 = vst [vmem:[#allocation3] sm:$0x3] %v229_v0  ;;  %v54_v2 = vld [vmem:[#allocation5 + $0x2] sm:$0x3]  ;;  %v62_v3 = vld [vmem:[#allocation5 + $0x4] sm:$0x3]  ;;  %v50_v4 = vmul.f32 %v46_v1, %v46_v1 }
   0xc   :  { %43 = vst [vmem:[#allocation2] sm:$0x3] %v229_v0  ;;  %v58_v5 = vmul.f32 %v54_v2, %v54_v2  ;;  %v66_v6 = vmul.f32 %v62_v3, %v62_v3  ;;  %v70_v7 = vld [vmem:[#allocation5 + $0x6] sm:$0x3]  ;;  %v78_v8 = vld [vmem:[#allocation5 + $0x8] sm:$0x3] }
   0xd   :  { %45 = vst [vmem:[#allocation4] sm:$0x3] %v229_v0  ;;  %v74_v10 = vmul.f32 %v70_v7, %v70_v7  ;;  %v47_v11 = vld [vmem:[#allocation7] sm:$0x3]  ;;  %v55_v12 = vld [vmem:[#allocation7 + $0x2] sm:$0x3]  ;;  %v82_v21 = vmul.f32 %v78_v8, %v78_v8 }
   0xe   :  { %v59_v9 = vadd.f32 %v58_v5, %v50_v4  ;;  %v63_v13 = vld [vmem:[#allocation7 + $0x4] sm:$0x3]  ;;  %v86_v14 = vld [vmem:[#allocation5 + $0xa] sm:$0x3]  ;;  %v52_v15 = vmul.f32 %v47_v11, %v47_v11  ;;  %v60_v16 = vmul.f32 %v55_v12, %v55_v12  ;;  %v71_v18 = vld [vmem:[#allocation7 + $0x6] sm:$0x3]  ;;  %v48_v19 = vmul.f32 %v47_v11, %v46_v1 }
   0xf   :  { %v68_v17 = vmul.f32 %v63_v13, %v63_v13  ;;  %v79_v22 = vld [vmem:[#allocation7 + $0x8] sm:$0x3]  ;;  %v94_v23 = vld [vmem:[#allocation5 + $0xc] sm:$0x3]  ;;  %v76_v25 = vmul.f32 %v71_v18, %v71_v18  ;;  %v56_v26 = vmul.f32 %v55_v12, %v54_v2  ;;  %v90_v28 = vmul.f32 %v86_v14, %v86_v14  ;;  %v87_v29 = vld [vmem:[#allocation7 + $0xa] sm:$0x3] }
  0x10   :  { %v67_v20 = vadd.f32 %v66_v6, %v59_v9  ;;  %v61_v24 = vadd.f32 %v60_v16, %v52_v15  ;;  %v64_v30 = vmul.f32 %v63_v13, %v62_v3  ;;  %v102_v31 = vld [vmem:[#allocation5 + $0xe] sm:$0x3]  ;;  %v84_v33 = vmul.f32 %v79_v22, %v79_v22  ;;  %v95_v38 = vld [vmem:[#allocation7 + $0xc] sm:$0x3]  ;;  %v103_v45 = vld [vmem:[#allocation7 + $0xe] sm:$0x3] }
  0x11   :  { %v57_v34 = vadd.f32 %v56_v26, %v48_v19  ;;  %v72_v35 = vmul.f32 %v71_v18, %v70_v7  ;;  %v98_v37 = vmul.f32 %v94_v23, %v94_v23  ;;  %v92_v40 = vmul.f32 %v87_v29, %v87_v29 }
  0x12   :  { %v75_v27 = vadd.f32 %v74_v10, %v67_v20  ;;  %v69_v32 = vadd.f32 %v68_v17, %v61_v24  ;;  %v80_v42 = vmul.f32 %v79_v22, %v78_v8  ;;  %v106_v44 = vmul.f32 %v102_v31, %v102_v31  ;;  %v113_v51 = vld [vmem:[#allocation3] sm:$0x3] }
  0x13   :  { %v65_v41 = vadd.f32 %v64_v30, %v57_v34  ;;  %v100_v47 = vmul.f32 %v95_v38, %v95_v38  ;;  %v88_v49 = vmul.f32 %v87_v29, %v86_v14  ;;  %v108_v53 = vmul.f32 %v103_v45, %v103_v45  ;;  %v110_v0 = vld [vmem:[#allocation2] sm:$0x3] }
  0x14   :  { %v83_v36 = vadd.f32 %v82_v21, %v75_v27  ;;  %v77_v39 = vadd.f32 %v76_v25, %v69_v32  ;;  %v96_v55 = vmul.f32 %v95_v38, %v94_v23  ;;  %v104_v59 = vmul.f32 %v103_v45, %v102_v31  ;;  %v116_v61 = vld [vmem:[#allocation4] sm:$0x3] }
  0x15   :  { %v73_v48 = vadd.f32 %v72_v35, %v65_v41  ;;  %vm160_vm7 = vcmask 1024  }
  0x16   :  { %v91_v43 = vadd.f32 %v90_v28, %v83_v36  ;;  %v85_v46 = vadd.f32 %v84_v33, %v77_v39 }
  0x17   :  { %v81_v54 = vadd.f32 %v80_v42, %v73_v48 }
  0x18   :  { %v99_v50 = vadd.f32 %v98_v37, %v91_v43  ;;  %v93_v52 = vadd.f32 %v92_v40, %v85_v46 }
  0x19   :  { %v89_v58 = vadd.f32 %v88_v49, %v81_v54 }
  0x1a   :  { %v107_v56 = vadd.f32 %v106_v44, %v99_v50  ;;  %v101_v57 = vadd.f32 %v100_v47, %v93_v52 }
  0x1b   :  { %v97_v63 = vadd.f32 %v96_v55, %v89_v58 }
  0x1c   :  { %v114_v60 = vadd.f32 %v113_v51, %v107_v56  ;;  %v109_v62 = vadd.f32 %v108_v53, %v101_v57 }
  0x1d   :  { %v105_v2 = vadd.f32 %v104_v59, %v97_v63 }
  0x1e   :  { %115 = vst [vmem:[#allocation3] sm:$0x3] %v114_v60  ;;  %v117_v1 = vadd.f32 %v116_v61, %v109_v62 }
  0x1f   :  { %v111_v3 = vadd.f32 %v110_v0, %v105_v2 }
  0x20   :  { %118 = vst [vmem:[#allocation4] sm:$0x3] %v117_v1 }
  0x21   :  { %112 = vst [vmem:[#allocation2] sm:$0x3] %v111_v3 }
  0x25   :  { %v127_v4 = vld [vmem:[#allocation3] sm:$0x3] }
  0x26   :  { %v128_v5 = vsel %vm123_vm0, %v127_v4, 0.0 }
  0x27   :  { %129 = vadd.xlane.f32.xlu0 %v128_v5  ;;  %v131_v6 = vld [vmem:[#allocation4] sm:$0x3] }
  0x28   :  { %v122_v7 = vld [vmem:[#allocation2] sm:$0x3]  ;;  %v132_v9 = vsel %vm123_vm0, %v131_v6, 0.0 }
  0x29   :  { %v124_v8 = vsel %vm123_vm0, %v122_v7, 0.0 }
  0x2a   :  { %125 = vadd.xlane.f32.xlu1 %v124_v8 }
  0x2f   :  { %133 = vadd.xlane.f32.xlu0 %v132_v9 }
  0x9a   :  { %v130_v10 = vpop.xlane.xlu0 %129 }
  0x9b   :  { %171 = vrsqrt.f32 %v130_v10  ;;  %vm141_vm2 = vweird.f32 %v130_v10 }
  0x9d   :  { %v126_v26 = vpop.xlane.xlu1 %125 }
  0xa1   :  { %v172_v11 = vpop.eup %171 }
  0xa2   :  { %v136_v12 = vmul.f32 %v172_v11, %v130_v10  ;;  %v134_v13 = vpop.xlane.xlu0 %133  ;;  %vm142_vm1 = vweird.f32 %v172_v11 }
  0xa3   :  { %173 = vrsqrt.f32 %v134_v13  ;;  %vm143_vm3 = vmor %vm141_vm2, %vm142_vm1  ;;  %vm152_vm5 = vweird.f32 %v134_v13 }
  0xa4   :  { %v137_v14 = vmul.f32 %v172_v11, %v136_v12 }
  0xa6   :  { %v138_v15 = vmul.f32 0.5, %v137_v14 }
  0xa8   :  { %v139_v16 = vsub.f32 1.5, %v138_v15 }
  0xa9   :  { %v174_v17 = vpop.eup %173 }
  0xaa   :  { %v147_v18 = vmul.f32 %v174_v17, %v134_v13  ;;  %v140_v19 = vmul.f32 %v172_v11, %v139_v16  ;;  %vm153_vm4 = vweird.f32 %v174_v17 }
  0xab   :  { %vm154_vm6 = vmor %vm152_vm5, %vm153_vm4 }
  0xac   :  { %v148_v20 = vmul.f32 %v174_v17, %v147_v18  ;;  %v144_v22 = vsel %vm143_vm3, %v172_v11, %v140_v19 }
  0xad   :  { %v145_v24 = vmin.f32 %v144_v22, 1e+08 }
  0xae   :  { %v149_v21 = vmul.f32 0.5, %v148_v20 }
  0xaf   :  { %v157_v29 = vmul.f32 %v145_v24, %v126_v26 }
  0xb0   :  { %v150_v23 = vsub.f32 1.5, %v149_v21 }
  0xb2   :  { %v151_v25 = vmul.f32 %v174_v17, %v150_v23 }
  0xb4   :  { %v155_v27 = vsel %vm154_vm6, %v174_v17, %v151_v25 }
  0xb5   :  { %v156_v28 = vmin.f32 %v155_v27, 1e+08 }
  0xb7   :  { %v158_v30 = vmul.f32 %v157_v29, %v156_v28 }
  0xb9   :  { %v159_v31 = vsub.f32 1.0, %v158_v30 }
  0xbb   :  { %161 = vst.msk [vmem:[%s256_s2] sm:$0x3] %vm160_vm7, %v159_v31 }
  0xbc   :  { %166 = vsyncpa [#allocation6], 1 }
  0xbd   :  { %167 = vsyncpa [#allocation8], 1 }

</bundles_post_ra>
